<compile_context>
chip_gen: v7x
topology: tpu7x:2x2x1
jax: 0.10.0
libtpu: 0.0.40
codegen_flags: <defaults>
</compile_context>

<pallas_src>
import jax
import jax.numpy as jnp
from jax.experimental import pallas as pl
from jax.experimental.pallas import tpu as pltpu


SW = 32  # per-stream channel width after zero padding (20 -> 32, bf16 sublane aligned)


def _cdiv(a, b):
    return (a + b - 1) // b


def _roundup(a, b):
    return _cdiv(a, b) * b


def _leaky(x, slope=0.2):
    # identical to where(x > 0, x, slope*x) for 0 < slope < 1; 2 VALU ops
    return jnp.maximum(x, slope * x)


def spe_kernel(x_ref,      # (1, C_in, tp)        bf16
               wb_ref,     # (3*SW, C_in)         bf16   begin weight (padded)
               bb_ref,     # (3*SW, 1)            bf16
               ws_ref,     # (3, SW, SW)          bf16   stream weights (padded)
               bs_ref,     # (3, SW, 1)           bf16
               we_ref,     # (C_out, 3*SW)        bf16   end weight (padded cols)
               be_ref,     # (C_out, 1)           f32
               o_ref):     # (1, C_out, tp)       f32
    sw = ws_ref.shape[1]
    cd = bb_ref.dtype                       # activation compute dtype (bf16)

    x = x_ref[0]                                               # (C_in, tp)

    # begin: ONE (3*SW, C_in) @ (C_in, tp) matmul + bias + LeakyReLU.
    # Padded channel rows have zero weight/bias -> stay exactly 0 after leaky.
    x1 = _leaky(
        jnp.dot(wb_ref[...], x, preferred_element_type=jnp.float32).astype(cd)
        + bb_ref[...])                                         # (3*SW, tp)

    s1 = x1[0 * sw:1 * sw]                                     # aligned slices
    s2 = x1[1 * sw:2 * sw]
    s3 = x1[2 * sw:3 * sw]

    # stream1 / stream2 / stream3: chained (SW, SW) convs + LeakyReLU
    m1 = _leaky(jnp.dot(ws_ref[0], s1,
                        preferred_element_type=jnp.float32).astype(cd) + bs_ref[0])
    m2 = _leaky(jnp.dot(ws_ref[1], s2 + m1,
                        preferred_element_type=jnp.float32).astype(cd) + bs_ref[1])
    m3 = _leaky(jnp.dot(ws_ref[2], s3 + m2,
                        preferred_element_type=jnp.float32).astype(cd) + bs_ref[2])

    # x2 = x1 + concat(m1, m2, m3); stream offsets are sublane-tile aligned
    x2 = jnp.concatenate([s1 + m1, s2 + m2, s3 + m3], axis=0)  # (3*SW, tp)

    # end: ONE (C_out, 3*SW) @ (3*SW, tp) matmul + bias + LeakyReLU (f32 out)
    out = _leaky(jnp.dot(we_ref[...], x2, preferred_element_type=jnp.float32)
                 + be_ref[...])
    o_ref[0] = out.astype(o_ref.dtype)


def prepare_spe_params(params, compute_dtype=jnp.bfloat16):
    """One-time weight restructuring: pad each 20-ch stream to SW channels,
    stack, and cast to the compute dtype. PyTorch Conv2d layout in, packed out."""
    wb, bb = params["wb"], params["bb"]            # (60, C_in), (60,)
    we, be = params["we"], params["be"]            # (C_out, 60), (C_out,)
    C_in = wb.shape[1]
    C_out = we.shape[0]

    # begin: (60, C_in) -> (3*SW, C_in), rows [k*SW : k*SW+20] hold stream k
    wb3 = wb.reshape(3, 20, C_in)
    wb_p = jnp.zeros((3, SW, C_in), wb.dtype).at[:, :20].set(wb3).reshape(3 * SW, C_in)
    bb_p = jnp.zeros((3, SW, 1), bb.dtype).at[:, :20, 0].set(bb.reshape(3, 20)).reshape(3 * SW, 1)

    # streams: (20, 20) -> (SW, SW) with only the [:20, :20] block nonzero
    ws = jnp.stack([params["w1"], params["w2"], params["w3"]])        # (3,20,20)
    bs = jnp.stack([params["b1"], params["b2"], params["b3"]])        # (3,20)
    ws_p = jnp.zeros((3, SW, SW), ws.dtype).at[:, :20, :20].set(ws)
    bs_p = jnp.zeros((3, SW, 1), bs.dtype).at[:, :20, 0].set(bs)

    # end: (C_out, 60) -> (C_out, 3*SW), cols [k*SW : k*SW+20] hold stream k
    we3 = we.reshape(C_out, 3, 20)
    we_p = jnp.zeros((C_out, 3, SW), we.dtype).at[:, :, :20].set(we3).reshape(C_out, 3 * SW)

    cd = compute_dtype
    return dict(
        wb=wb_p.astype(cd), bb=bb_p.astype(cd),
        ws=ws_p.astype(cd), bs=bs_p.astype(cd),
        we=we_p.astype(cd), be=be.reshape(C_out, 1).astype(jnp.float32),
        C_in=C_in, C_out=C_out,
    )


def spe_forward_pallas(x_nchw, prepped, *, tp=8192):
    """x_nchw: (N, C_in, H, W) float32.  Returns (N, C_out, H, W) float32."""
    N, C_in, H, W = x_nchw.shape
    assert C_in == prepped["C_in"]
    C_out = prepped["C_out"]
    HW = H * W

    # Balanced pixel tiling: waste < 128 pixels per final tile, and guarantee
    # >= 2 grid steps when N == 1 so both TCs on a v7x chip get work.
    ntiles = _cdiv(HW, tp)
    if N * ntiles < 2 and HW > 128:
        ntiles = 2
    tp_eff = _roundup(_cdiv(HW, ntiles), 128)
    HW_pad = tp_eff * ntiles

    cd = prepped["wb"].dtype
    x3d = x_nchw.reshape(N, C_in, HW).astype(cd)       # zero-copy view + bf16 cast
    if HW_pad != HW:
        x3d = jnp.pad(x3d, ((0, 0), (0, 0), (0, HW_pad - HW)))

    grid = (N, HW_pad // tp_eff)
    full2 = lambda b, j: (0, 0)
    full3 = lambda b, j: (0, 0, 0)

    out3d = pl.pallas_call(
        spe_kernel,
        out_shape=jax.ShapeDtypeStruct((N, C_out, HW_pad), jnp.float32),
        grid_spec=pltpu.PrefetchScalarGridSpec(
            num_scalar_prefetch=0,
            grid=grid,
            in_specs=[
                pl.BlockSpec((1, C_in, tp_eff), lambda b, j: (b, 0, j)),
                pl.BlockSpec(prepped["wb"].shape, full2),
                pl.BlockSpec(prepped["bb"].shape, full2),
                pl.BlockSpec(prepped["ws"].shape, full3),
                pl.BlockSpec(prepped["bs"].shape, full3),
                pl.BlockSpec(prepped["we"].shape, full2),
                pl.BlockSpec(prepped["be"].shape, full2),
            ],
            out_specs=pl.BlockSpec((1, C_out, tp_eff), lambda b, j: (b, 0, j)),
        ),
        compiler_params=pltpu.CompilerParams(
            # both grid axes are independent -> shard across TCs on multi-core parts
            dimension_semantics=("parallel", "parallel"),
            # plenty for the ~10 MiB working set at tp=8192; < v7x 64 MiB physical
            vmem_limit_bytes=48 * 1024 * 1024,
        ),
    )(x3d, prepped["wb"], prepped["bb"], prepped["ws"], prepped["bs"],
      prepped["we"], prepped["be"])

    if HW_pad != HW:
        out3d = out3d[:, :, :HW]
    return out3d.reshape(N, C_out, H, W)


def spe_forward_reference(x_nchw, params):
    """Pure-JAX f32 reference mirroring the PyTorch forward exactly (NCHW)."""
    def conv1x1(x, w, b):
        return jnp.einsum('oc,nchw->nohw', w, x) + b[None, :, None, None]
    lk = lambda v: jnp.where(v > 0, v, 0.2 * v)
    x1 = lk(conv1x1(x_nchw, params["wb"], params["bb"]))
    s1, s2, s3 = x1[:, 0:20], x1[:, 20:40], x1[:, 40:60]
    m1 = lk(conv1x1(s1, params["w1"], params["b1"]))
    m2 = lk(conv1x1(s2 + m1, params["w2"], params["b2"]))
    m3 = lk(conv1x1(s3 + m2, params["w3"], params["b3"]))
    x2 = x1 + jnp.concatenate([m1, m2, m3], axis=1)
    return lk(conv1x1(x2, params["we"], params["be"]))


def make_params(key, input_channel, output_channel):
    """Deterministic synthetic parameters, PyTorch Conv2d-style shapes:
    weight (C_out, C_in), bias (C_out,)."""
    ks = jax.random.split(key, 10)

    def conv(kw, kb, cin, cout):
        scale = 1.0 / jnp.sqrt(cin)
        w = jax.random.uniform(kw, (cout, cin), jnp.float32, -scale, scale)
        b = jax.random.uniform(kb, (cout,), jnp.float32, -scale, scale)
        return w, b

    wb, bb = conv(ks[0], ks[1], input_channel, 60)
    w1, b1 = conv(ks[2], ks[3], 20, 20)
    w2, b2 = conv(ks[4], ks[5], 20, 20)
    w3, b3 = conv(ks[6], ks[7], 20, 20)
    we, be = conv(ks[8], ks[9], 60, output_channel)
    return dict(wb=wb, bb=bb, w1=w1, b1=b1, w2=w2, b2=b2,
                w3=w3, b3=b3, we=we, be=be)


if __name__ == "__main__":
    key = jax.random.PRNGKey(0)
    k_x, k_p = jax.random.split(key)

    N, C_in, H, W = 2, 4, 16, 16
    C_out = 4
    x = jax.random.normal(k_x, (N, C_in, H, W), jnp.float32)
    params = make_params(k_p, C_in, C_out)
    prepped = prepare_spe_params(params)          # one-time weight prep (bf16)

    # main test shape (no pixel padding needed: HW = 256)
    out = jax.block_until_ready(spe_forward_pallas(x, prepped))
    ref = spe_forward_reference(x, params)
    assert out.shape == (N, C_out, H, W)
    # bf16 operands/activations (f32 accumulation) -> loosened tolerance
    assert jnp.allclose(out, ref, atol=5e-2, rtol=5e-2), "mismatch vs reference"

    # odd spatial size exercises the balanced-tile / pixel-padding path
    x2 = jax.random.normal(k_x, (N, C_in, 17, 17), jnp.float32)
    out2 = jax.block_until_ready(spe_forward_pallas(x2, prepped))
    ref2 = spe_forward_reference(x2, params)
    assert out2.shape == (N, C_out, 17, 17)
    assert jnp.allclose(out2, ref2, atol=5e-2, rtol=5e-2), "mismatch vs reference (padded)"

    print("KERNEL_OK")
</pallas_src>

<mosaic_0001>
module attributes {stable_mosaic.version = 11 : i64} {
  func.func @spe_kernel(%arg0: i32, %arg1: i32, %arg2: memref<1x4x256xbf16, #tpu.memory_space<vmem>>, %arg3: memref<96x4xbf16, #tpu.memory_space<vmem>>, %arg4: memref<96x1xbf16, #tpu.memory_space<vmem>>, %arg5: memref<3x32x32xbf16, #tpu.memory_space<vmem>>, %arg6: memref<3x32x1xbf16, #tpu.memory_space<vmem>>, %arg7: memref<4x96xbf16, #tpu.memory_space<vmem>>, %arg8: memref<4x1xf32, #tpu.memory_space<vmem>>, %arg9: memref<1x4x256xf32, #tpu.memory_space<vmem>>) attributes {dimension_semantics = [#tpu.dimension_semantics<parallel>, #tpu.dimension_semantics<parallel>], iteration_bounds = array<i64: 2, 1>, scalar_prefetch = 0 : i64, scratch_operands = 0 : i64, tpu.core_type = #tpu.core_type<tc>, window_params = [{transform_indices = @transform_0, window_bounds = array<i64: 1, 4, 256>}, {pipeline_mode = #tpu.pipeline_mode<synchronous>, transform_indices = @transform_1, window_bounds = array<i64: 96, 4>}, {pipeline_mode = #tpu.pipeline_mode<synchronous>, transform_indices = @transform_2, window_bounds = array<i64: 96, 1>}, {pipeline_mode = #tpu.pipeline_mode<synchronous>, transform_indices = @transform_3, window_bounds = array<i64: 3, 32, 32>}, {pipeline_mode = #tpu.pipeline_mode<synchronous>, transform_indices = @transform_4, window_bounds = array<i64: 3, 32, 1>}, {pipeline_mode = #tpu.pipeline_mode<synchronous>, transform_indices = @transform_5, window_bounds = array<i64: 4, 96>}, {pipeline_mode = #tpu.pipeline_mode<synchronous>, transform_indices = @transform_6, window_bounds = array<i64: 4, 1>}, {transform_indices = @transform_7, window_bounds = array<i64: 1, 4, 256>}]} {
    %c0 = arith.constant 0 : index
    %c0_0 = arith.constant 0 : index
    %c0_1 = arith.constant 0 : index
    %0 = vector.load %arg2[%c0, %c0_0, %c0_1] : memref<1x4x256xbf16, #tpu.memory_space<vmem>>, vector<1x4x256xbf16>
    %1 = vector.shape_cast %0 : vector<1x4x256xbf16> to vector<4x256xbf16>
    %c0_2 = arith.constant 0 : index
    %c0_3 = arith.constant 0 : index
    %2 = vector.load %arg3[%c0_2, %c0_3] : memref<96x4xbf16, #tpu.memory_space<vmem>>, vector<96x4xbf16>
    %cst = arith.constant dense<0.000000e+00> : vector<96x256xf32>
    %3 = tpu.matmul %2, %1, %cst {dimension_numbers = #tpu.dot_dimension_numbers<[1], [0], [0], [1], [0, 0, 1, 1], [], []>} : vector<96x4xbf16>, vector<4x256xbf16>, vector<96x256xf32> -> vector<96x256xf32>
    %4 = arith.truncf %3 : vector<96x256xf32> to vector<96x256xbf16>
    %c0_4 = arith.constant 0 : index
    %c0_5 = arith.constant 0 : index
    %5 = vector.load %arg4[%c0_4, %c0_5] : memref<96x1xbf16, #tpu.memory_space<vmem>>, vector<96x1xbf16>
    %6 = vector.broadcast %5 : vector<96x1xbf16> to vector<96x256xbf16>
    %7 = arith.addf %4, %6 : vector<96x256xbf16>
    %cst_6 = arith.constant 2.001950e-01 : bf16
    %8 = vector.broadcast %cst_6 : bf16 to vector<96x256xbf16>
    %9 = arith.mulf %8, %7 : vector<96x256xbf16>
    %10 = arith.maximumf %7, %9 : vector<96x256xbf16>
    %11 = vector.extract_strided_slice %10 {offsets = [0, 0], sizes = [32, 256], strides = [1, 1]} : vector<96x256xbf16> to vector<32x256xbf16>
    %12 = vector.extract_strided_slice %10 {offsets = [32, 0], sizes = [32, 256], strides = [1, 1]} : vector<96x256xbf16> to vector<32x256xbf16>
    %13 = vector.extract_strided_slice %10 {offsets = [64, 0], sizes = [32, 256], strides = [1, 1]} : vector<96x256xbf16> to vector<32x256xbf16>
    %c0_7 = arith.constant 0 : index
    %c0_8 = arith.constant 0 : index
    %c0_9 = arith.constant 0 : index
    %14 = vector.load %arg5[%c0_7, %c0_8, %c0_9] : memref<3x32x32xbf16, #tpu.memory_space<vmem>>, vector<1x32x32xbf16>
    %15 = vector.shape_cast %14 : vector<1x32x32xbf16> to vector<32x32xbf16>
    %cst_10 = arith.constant dense<0.000000e+00> : vector<32x256xf32>
    %16 = tpu.matmul %15, %11, %cst_10 {dimension_numbers = #tpu.dot_dimension_numbers<[1], [0], [0], [1], [0, 0, 1, 1], [], []>} : vector<32x32xbf16>, vector<32x256xbf16>, vector<32x256xf32> -> vector<32x256xf32>
    %17 = arith.truncf %16 : vector<32x256xf32> to vector<32x256xbf16>
    %c0_11 = arith.constant 0 : index
    %c0_12 = arith.constant 0 : index
    %c0_13 = arith.constant 0 : index
    %18 = vector.load %arg6[%c0_11, %c0_12, %c0_13] : memref<3x32x1xbf16, #tpu.memory_space<vmem>>, vector<1x32x1xbf16>
    %19 = vector.shape_cast %18 : vector<1x32x1xbf16> to vector<32x1xbf16>
    %20 = vector.broadcast %19 : vector<32x1xbf16> to vector<32x256xbf16>
    %21 = arith.addf %17, %20 : vector<32x256xbf16>
    %cst_14 = arith.constant 2.001950e-01 : bf16
    %22 = vector.broadcast %cst_14 : bf16 to vector<32x256xbf16>
    %23 = arith.mulf %22, %21 : vector<32x256xbf16>
    %24 = arith.maximumf %21, %23 : vector<32x256xbf16>
    %c1 = arith.constant 1 : index
    %c0_15 = arith.constant 0 : index
    %c0_16 = arith.constant 0 : index
    %25 = vector.load %arg5[%c1, %c0_15, %c0_16] : memref<3x32x32xbf16, #tpu.memory_space<vmem>>, vector<1x32x32xbf16>
    %26 = vector.shape_cast %25 : vector<1x32x32xbf16> to vector<32x32xbf16>
    %27 = arith.addf %12, %24 : vector<32x256xbf16>
    %cst_17 = arith.constant dense<0.000000e+00> : vector<32x256xf32>
    %28 = tpu.matmul %26, %27, %cst_17 {dimension_numbers = #tpu.dot_dimension_numbers<[1], [0], [0], [1], [0, 0, 1, 1], [], []>} : vector<32x32xbf16>, vector<32x256xbf16>, vector<32x256xf32> -> vector<32x256xf32>
    %29 = arith.truncf %28 : vector<32x256xf32> to vector<32x256xbf16>
    %c1_18 = arith.constant 1 : index
    %c0_19 = arith.constant 0 : index
    %c0_20 = arith.constant 0 : index
    %30 = vector.load %arg6[%c1_18, %c0_19, %c0_20] : memref<3x32x1xbf16, #tpu.memory_space<vmem>>, vector<1x32x1xbf16>
    %31 = vector.shape_cast %30 : vector<1x32x1xbf16> to vector<32x1xbf16>
    %32 = vector.broadcast %31 : vector<32x1xbf16> to vector<32x256xbf16>
    %33 = arith.addf %29, %32 : vector<32x256xbf16>
    %cst_21 = arith.constant 2.001950e-01 : bf16
    %34 = vector.broadcast %cst_21 : bf16 to vector<32x256xbf16>
    %35 = arith.mulf %34, %33 : vector<32x256xbf16>
    %36 = arith.maximumf %33, %35 : vector<32x256xbf16>
    %c2 = arith.constant 2 : index
    %c0_22 = arith.constant 0 : index
    %c0_23 = arith.constant 0 : index
    %37 = vector.load %arg5[%c2, %c0_22, %c0_23] : memref<3x32x32xbf16, #tpu.memory_space<vmem>>, vector<1x32x32xbf16>
    %38 = vector.shape_cast %37 : vector<1x32x32xbf16> to vector<32x32xbf16>
    %39 = arith.addf %13, %36 : vector<32x256xbf16>
    %cst_24 = arith.constant dense<0.000000e+00> : vector<32x256xf32>
    %40 = tpu.matmul %38, %39, %cst_24 {dimension_numbers = #tpu.dot_dimension_numbers<[1], [0], [0], [1], [0, 0, 1, 1], [], []>} : vector<32x32xbf16>, vector<32x256xbf16>, vector<32x256xf32> -> vector<32x256xf32>
    %41 = arith.truncf %40 : vector<32x256xf32> to vector<32x256xbf16>
    %c2_25 = arith.constant 2 : index
    %c0_26 = arith.constant 0 : index
    %c0_27 = arith.constant 0 : index
    %42 = vector.load %arg6[%c2_25, %c0_26, %c0_27] : memref<3x32x1xbf16, #tpu.memory_space<vmem>>, vector<1x32x1xbf16>
    %43 = vector.shape_cast %42 : vector<1x32x1xbf16> to vector<32x1xbf16>
    %44 = vector.broadcast %43 : vector<32x1xbf16> to vector<32x256xbf16>
    %45 = arith.addf %41, %44 : vector<32x256xbf16>
    %cst_28 = arith.constant 2.001950e-01 : bf16
    %46 = vector.broadcast %cst_28 : bf16 to vector<32x256xbf16>
    %47 = arith.mulf %46, %45 : vector<32x256xbf16>
    %48 = arith.maximumf %45, %47 : vector<32x256xbf16>
    %49 = arith.addf %11, %24 : vector<32x256xbf16>
    %50 = arith.addf %12, %36 : vector<32x256xbf16>
    %51 = arith.addf %13, %48 : vector<32x256xbf16>
    %52 = tpu.concatenate %49, %50, %51 in 0 : vector<32x256xbf16>, vector<32x256xbf16>, vector<32x256xbf16> -> vector<96x256xbf16>
    %c0_29 = arith.constant 0 : index
    %c0_30 = arith.constant 0 : index
    %53 = vector.load %arg7[%c0_29, %c0_30] : memref<4x96xbf16, #tpu.memory_space<vmem>>, vector<4x96xbf16>
    %cst_31 = arith.constant dense<0.000000e+00> : vector<4x256xf32>
    %54 = tpu.matmul %53, %52, %cst_31 {dimension_numbers = #tpu.dot_dimension_numbers<[1], [0], [0], [1], [0, 0, 1, 1], [], []>} : vector<4x96xbf16>, vector<96x256xbf16>, vector<4x256xf32> -> vector<4x256xf32>
    %c0_32 = arith.constant 0 : index
    %c0_33 = arith.constant 0 : index
    %55 = vector.load %arg8[%c0_32, %c0_33] : memref<4x1xf32, #tpu.memory_space<vmem>>, vector<4x1xf32>
    %56 = vector.broadcast %55 : vector<4x1xf32> to vector<4x256xf32>
    %57 = arith.addf %54, %56 : vector<4x256xf32>
    %cst_34 = arith.constant 2.000000e-01 : f32
    %58 = vector.broadcast %cst_34 : f32 to vector<4x256xf32>
    %59 = arith.mulf %58, %57 : vector<4x256xf32>
    %60 = arith.maximumf %57, %59 : vector<4x256xf32>
    %c0_35 = arith.constant 0 : index
    %c0_36 = arith.constant 0 : index
    %c0_37 = arith.constant 0 : index
    %61 = vector.load %arg9[%c0_35, %c0_36, %c0_37] : memref<1x4x256xf32, #tpu.memory_space<vmem>>, vector<1x4x256xf32>
    %62 = vector.shape_cast %61 : vector<1x4x256xf32> to vector<4x256xf32>
    %63 = vector.shape_cast %60 : vector<4x256xf32> to vector<1x4x256xf32>
    tpu.vector_store %arg9[%c0_35, %c0_36, %c0_37], %63 {strides = array<i32>} : memref<1x4x256xf32, #tpu.memory_space<vmem>>, vector<1x4x256xf32>,
    return
  }
  func.func @transform_0(%arg0: i32, %arg1: i32) -> (i32, i32, i32) {
    %c0_i32 = arith.constant 0 : i32
    %c0_i32_0 = arith.constant 0 : i32
    return %arg0, %c0_i32, %arg1 : i32, i32, i32
  }
  func.func @transform_1(%arg0: i32, %arg1: i32) -> (i32, i32) {
    %c0_i32 = arith.constant 0 : i32
    %c0_i32_0 = arith.constant 0 : i32
    %c0_i32_1 = arith.constant 0 : i32
    return %c0_i32, %c0_i32_0 : i32, i32
  }
  func.func @transform_2(%arg0: i32, %arg1: i32) -> (i32, i32) {
    %c0_i32 = arith.constant 0 : i32
    %c0_i32_0 = arith.constant 0 : i32
    %c0_i32_1 = arith.constant 0 : i32
    return %c0_i32, %c0_i32_0 : i32, i32
  }
  func.func @transform_3(%arg0: i32, %arg1: i32) -> (i32, i32, i32) {
    %c0_i32 = arith.constant 0 : i32
    %c0_i32_0 = arith.constant 0 : i32
    %c0_i32_1 = arith.constant 0 : i32
    %c0_i32_2 = arith.constant 0 : i32
    return %c0_i32, %c0_i32_0, %c0_i32_1 : i32, i32, i32
  }
  func.func @transform_4(%arg0: i32, %arg1: i32) -> (i32, i32, i32) {
    %c0_i32 = arith.constant 0 : i32
    %c0_i32_0 = arith.constant 0 : i32
    %c0_i32_1 = arith.constant 0 : i32
    %c0_i32_2 = arith.constant 0 : i32
    return %c0_i32, %c0_i32_0, %c0_i32_1 : i32, i32, i32
  }
  func.func @transform_5(%arg0: i32, %arg1: i32) -> (i32, i32) {
    %c0_i32 = arith.constant 0 : i32
    %c0_i32_0 = arith.constant 0 : i32
    %c0_i32_1 = arith.constant 0 : i32
    return %c0_i32, %c0_i32_0 : i32, i32
  }
  func.func @transform_6(%arg0: i32, %arg1: i32) -> (i32, i32) {
    %c0_i32 = arith.constant 0 : i32
    %c0_i32_0 = arith.constant 0 : i32
    %c0_i32_1 = arith.constant 0 : i32
    return %c0_i32, %c0_i32_0 : i32, i32
  }
  func.func @transform_7(%arg0: i32, %arg1: i32) -> (i32, i32, i32) {
    %c0_i32 = arith.constant 0 : i32
    %c0_i32_0 = arith.constant 0 : i32
    return %arg0, %c0_i32, %arg1 : i32, i32, i32
  }
}

</mosaic_0001>

<bundles_post_ra>
// kernel: tpu_custom_call.1
= control target key start
LH: loop header
LB: loop body
LE: loop exit
PB: predicated region body
PF: predicated region fallthrough
CT: control target
= control target key end

     0   :  { %12 = vsyncpa [#allocation3], 0  ;;  %s1992_s0 = inlined_call_operand.vmem [shape: bf16[2,4,256], index: 0, kind: input, shape index: {}]   ;;  %s1993_s1 = inlined_call_operand.vmem [shape: bf16[96,4], index: 1, kind: input, shape index: {}]   ;;  %s1994_s2 = inlined_call_operand.vmem [shape: bf16[96,1], index: 2, kind: input, shape index: {}]   ;;  %s1995_s3 = inlined_call_operand.vmem [shape: bf16[3,32,32], index: 3, kind: input, shape index: {}]   ;;  %s1996_s4 = inlined_call_operand.vmem [shape: bf16[3,32,1], index: 4, kind: input, shape index: {}]   ;;  %s1997_s5 = inlined_call_operand.vmem [shape: bf16[4,96], index: 5, kind: input, shape index: {}]   ;;  %s1998_s6 = inlined_call_operand.vmem [shape: f32[4,1], index: 6, kind: input, shape index: {}]   ;;  %s1999_s7 = inlined_call_operand.hbm [shape: f32[2,4,256], index: 7, kind: output, shape index: {}]  }
   0x1   :  { %14 = vsyncpa [#allocation3 + $0x1], 0  ;;  %s1623_s24 = smov 0   ;;  %s1625_s25 = smov 0  }
   0x2   :  { %s1627_s26 = smov 0   ;;  %s1629_s27 = smov 0  }
   0x3   :  { %s1631_s28 = smov 0   ;;  %s1633_s29 = smov 0  }
   0x4 LB: > { %s1359_s30 = sadd.s32 4294967295, %s1578_s29   ;;  %s1360_s8 = sadd.s32 4294967294, %s1578_s29   ;;  %s1578_s29 = sphi %s1633_s29, %s20_s29   ;;  %s1574_s28 = sphi %s1631_s28, %s2006_s28   ;;  %s1570_s27 = sphi %s1629_s27, %s2005_s27   ;;  %s1566_s26 = sphi %s1627_s26, %s2004_s26   ;;  %s1562_s25 = sphi %s1625_s25, %s2003_s25   ;;  %s1558_s24 = sphi %s1623_s24, %s2002_s24  }
   0x5   : > { %s32_s9 = sadd.s32 1, %s1574_s28  ;;  %s195_s10 = sadd.s32 1, %s1566_s26 }
   0x6   : > { %p34_p0 = scmp.ge.s32.totalorder %s32_s9, 2  ;;  %p205_p1 = scmp.ne.s32.totalorder %s1566_s26, %s1562_s25 }
   0x7   : > { %p206_p2 = scmp.eq.s32.totalorder %s1359_s30, 1  ;;  %p211_p3 = scmp.ne.s32.totalorder %s1562_s25, %s1558_s24 }
   0x8   : > { %s2008_s9 = smov (%p34_p0, %s32_s9), 0  ;;  %p212_p5 = scmp.eq.s32.totalorder %s1360_s8, 1 }
   0x9   : > { %p1663_p4 = por %p206_p2, %p205_p1  ;;  %s190_s12 = ssub.s32 %s1574_s28, %s2008_s9 }
   0xa   : > { %p1363_p6 = scmp.ge.s32.totalorder %s1578_s29, 1  ;;  %p193_p7 = scmp.eq.s32.totalorder %s190_s12, 0 }
   0xb   : > { %p1670_p8 = por %p212_p5, %p211_p3  ;;  %p261_p9 = scmp.lt.s32.totalorder %s1578_s29, 3 }
   0xc   : > { %s1676_s14 = scalar_select %p193_p7, %s1566_s26, %s195_s10  }
   0xd   : > { %p262_p10 = pnand %p1363_p6, %p261_p9 }
   0xe   : > { %p298_p11 = scmp.lt.s32.totalorder (!%p262_p10), %s1570_s27, 1  ;;  %v1580_v0 = vmov (!%p262_p10), 0   ;;  %vm381_vm0 = vcmask (!%p262_p10), 1041408   ;;  %v493_v1 = vld [vmem:[%s1994_s2] sm:$0xf] (!%p262_p10)  ;;  %vm362_vm1 = vcmask (!%p262_p10), 31744   ;;  %v513_v37 = vlaneseq (!%p262_p10) }
   0xf   : > { %265 = sbr.rel (%p262_p10) target bundleno = 1214 (0x4be), region = 48  ;;  %420 = vmatprep.mubr.bf16.mxu0 (!%p262_p10), %v1580_v0  ;;  %1486 = vset.pattern.permute.xlu0 (!%p262_p10), %v1580_v0  ;;  %v495_v5 = vld [vmem:[%s1994_s2 + $0x8] sm:$0xf] (!%p262_p10)  ;;  %v494_v6 = vld [vmem:[%s1994_s2 + $0x4] sm:$0xf] (!%p262_p10)  ;;  %v1490_v17 = vld [vmem:[%s1993_s1 + $0x10] sm:$0xff] (!%p262_p10)  }
  0x10   : > { %1487 = vset.pattern.permute.xlu1 (!%p262_p10), %v1580_v0  ;;  %774 = vmatprep.mubr.bf16.mxu1 (!%p262_p10), %v1580_v0  ;;  %v1488_v7 = vld [vmem:[%s1993_s1] sm:$0xff] (!%p262_p10)   ;;  %v496_v8 = vld [vmem:[%s1994_s2 + $0xc] sm:$0xf] (!%p262_p10)  ;;  %v497_v9 = vld [vmem:[%s1994_s2 + $0x10] sm:$0xf] (!%p262_p10)  ;;  %v514_v39 = vshrl.u32 (!%p262_p10), %v513_v37, 7 }
  0x11   : > { %507 = vperm.xlu0 (!%p262_p10), %1486, %v493_v1   ;;  %531 = vperm.xlu1 (!%p262_p10), %1487, %v495_v5   ;;  %v498_v10 = vld [vmem:[%s1994_s2 + $0x14] sm:$0xf] (!%p262_p10)  ;;  %v1489_v11 = vld [vmem:[%s1993_s1 + $0x8] sm:$0xff] (!%p262_p10)   ;;  %v799_v12 = vld [vmem:[%s1996_s4] sm:$0xf] (!%p262_p10)  ;;  %vm735_vm2 = vcmask (!%p262_p10), 261120  }
  0x12   : > { %v800_v13 = vld [vmem:[%s1996_s4 + $0x4] sm:$0xf] (!%p262_p10)  ;;  %v499_v14 = vld [vmem:[%s1994_s2 + $0x18] sm:$0xf] (!%p262_p10)  ;;  %v500_v15 = vld [vmem:[%s1994_s2 + $0x1c] sm:$0xf] (!%p262_p10) }
  0x13   : > { %v801_v16 = vld [vmem:[%s1996_s4 + $0x8] sm:$0xf] (!%p262_p10)  ;;  %v802_v18 = vld [vmem:[%s1996_s4 + $0xc] sm:$0xf] (!%p262_p10)  ;;  %v501_v19 = vld [vmem:[%s1994_s2 + $0x20] sm:$0xf] (!%p262_p10) }
  0x14   : > { %v502_v20 = vld [vmem:[%s1994_s2 + $0x24] sm:$0xf] (!%p262_p10)  ;;  %v1401_v21 = vld [vmem:[%s1996_s4 + $0x10] sm:$0xf] (!%p262_p10)  ;;  %v1491_v22 = vld [vmem:[%s1993_s1 + $0x18] sm:$0xff] (!%p262_p10)   ;;  %vm1212_vm3 = vcmask (!%p262_p10), 785408  }
  0x15   : > { %519 = vperm.xlu0 (!%p262_p10), %1486, %v494_v6   ;;  %543 = vperm.xlu1 (!%p262_p10), %1487, %v496_v8   ;;  %v1402_v23 = vld [vmem:[%s1996_s4 + $0x14] sm:$0xf] (!%p262_p10)  ;;  %v503_v24 = vld [vmem:[%s1994_s2 + $0x28] sm:$0xf] (!%p262_p10)  ;;  %v504_v25 = vld [vmem:[%s1994_s2 + $0x2c] sm:$0xf] (!%p262_p10) }
  0x16   : > { %s299_s15 = scalar_select %p298_p11, %s1570_s27, 1  ;;  %v1403_v26 = vld [vmem:[%s1996_s4 + $0x18] sm:$0xf]  ;;  %v1492_v27 = vld [vmem:[%s1993_s1 + $0x20] sm:$0xff]   ;;  %v1404_v28 = vld [vmem:[%s1996_s4 + $0x1c] sm:$0xf] }
  0x17   : > { %v1415_v29 = vld [vmem:[%s1996_s4 + $0x20] sm:$0xf]  ;;  %v1416_v30 = vld [vmem:[%s1996_s4 + $0x24] sm:$0xf]  ;;  %v1417_v31 = vld [vmem:[%s1996_s4 + $0x28] sm:$0xf] }
  0x18   : > { %s1427_s16 = sshll.u32 %s299_s15, 2  ;;  %v1493_v32 = vld [vmem:[%s1993_s1 + $0x28] sm:$0xff]   ;;  %v1206_v34 = vld [vmem:[%s1998_s6] sm:$0xf]  ;;  %v1581_v35 = vmov 839922192  }
  0x19   : > { %s305_s19 = scalar_lea.vmem %s1992_s0, %s1427_s16  ;;  %555 = vperm.xlu0 %1486, %v497_v9   ;;  %567 = vperm.xlu1 %1487, %v498_v10   ;;  %v1418_v33 = vld [vmem:[%s1996_s4 + $0x2c] sm:$0xf]  ;;  %v511_v36 = vunpack.c.l.s4 %v1581_v35  ;;  %s294_s18 = sand.u32 1, %s1562_s25  }
  0x1a   : > { %v1373_v2 = vld.sshfl [vmem:[%s305_s19] sm:$0x33 pattern:$0x76325410]  ;;  %s1364_s19 = sshll.u32 %s294_s18, 3  ;;  %s1428_s20 = sshll.u32 %s1570_s27, 7 }
  0x1b   : > { %v361_v3 = vcombine.high %v1373_v2, %v1373_v2  ;;  %v383_v4 = vsel %vm381_vm0, %v1373_v2, 0  ;;  %v512_v38 = vunpack.c.0.s8 %v511_v36  ;;  %s296_s21 = scalar_lea.vmem [#allocation2], %s1364_s19  ;;  %s1945_s8 = scalar_lea.hbm %s1999_s7, %s1428_s20 }
  0x1c   : > { %s1283_s22 = sshll.u32 %s296_s21, 4  ;;  %s1267_s10 = scalar_lea.sflag [#allocation3], %s294_s18  ;;  %s1947_s22 = int_to_ptr.vmem [resolvable:$true] %s1283_s22 }
  0x1d   : > { %1374 = vmatprep.subr.msk.bf16.mxu0 %vm381_vm0, %v361_v3  ;;  %805 = vperm.xlu0 %1486, %v799_v12   ;;  %v1792_v42 = vsub.s32 %v512_v38, %v514_v39  ;;  %s1500_s12 = scalar_lea.vmem %s1947_s22, 128  ;;  %s1582_s27 = smov [#allocation2]  }
  0x1e   : > { %389 = vmatpush1.bf16.msra.mxu0 %v383_v4  ;;  %817 = vperm.xlu1 %1487, %v800_v13   ;;  %p1501_p12 = scmp.ne.s32.totalorder %s1947_s22, %s1500_s12  ;;  %s1504_s15 = sshll.u32 %s1582_s27, 4  ;;  %s1505_s15 = int_to_ptr.vmem [resolvable:$false] %s1504_s15 }
  0x1f   : > { %s1506_s16 = scalar_lea.vmem %s1505_s15, 256  ;;  %p1507_p1 = scmp.lt.s32.totalorder %s1947_s22, %s1505_s15 }
  0x20   : > { %p1502_p13 = pnand %p1501_p12, %p1663_p4  ;;  %p1508_p2 = scmp.lt.s32.totalorder %s1506_s16, %s1500_s12 }
  0x21   : > { %1375 = vmatmul.mubr.msk.bf16.vlgmr.msra.gmra.mrb[0].mxu0 %vm362_vm1, %v1488_v7  ;;  %579 = vperm.xlu0 %1486, %v499_v14  }
  0x22   : > { %430 = vmatprep.mubr.bf16.mxu0 %v1580_v0  ;;  %591 = vperm.xlu1 %1487, %v500_v15   ;;  %p1503_p0 = pneg %p1502_p13  ;;  %p1509_p3 = por %p1508_p2, %p1507_p1 }
  0x24   : > { %p1510_p5 = pnand %p1509_p3, %p1503_p0 }
  0x25   : > { %829 = vperm.xlu0 %1486, %v801_v16  }
  0x26   : > { %841 = vperm.xlu1 %1487, %v802_v18  }
  0x29   : > { %1376 = vmatmul.mubr.msk.bf16.gmra.mrb[4].mxu0 %vm362_vm1, %v1489_v11  ;;  %603 = vperm.xlu0 %1486, %v501_v19  }
  0x2a   : > { %440 = vmatprep.mubr.bf16.mxu0 %v1580_v0  ;;  %615 = vperm.xlu1 %1487, %v502_v20  }
  0x2d   : > { %964 = vperm.xlu0 %1486, %v1401_v21  }
  0x2e   : > { %976 = vperm.xlu1 %1487, %v1402_v23  }
  0x31   : > { %1377 = vmatmul.mubr.msk.bf16.gmra.mrb[8].mxu0 %vm362_vm1, %v1490_v17  ;;  %627 = vperm.xlu0 %1486, %v503_v24  }
  0x32   : > { %450 = vmatprep.mubr.bf16.mxu0 %v1580_v0  ;;  %639 = vperm.xlu1 %1487, %v504_v25  }
  0x35   : > { %988 = vperm.xlu0 %1486, %v1403_v26  }
  0x36   : > { %1000 = vperm.xlu1 %1487, %v1404_v28  }
  0x39   : > { %1378 = vmatmul.mubr.msk.bf16.gmra.mrb[12].mxu0 %vm362_vm1, %v1491_v22  ;;  %1123 = vperm.xlu0 %1486, %v1415_v29   ;;  %v1494_v29 = vld [vmem:[%s1995_s3] sm:$0xff]  }
  0x3a   : > { %460 = vmatprep.mubr.bf16.mxu0 %v1580_v0  ;;  %1135 = vperm.xlu1 %1487, %v1416_v30  }
  0x3d   : > { %1147 = vperm.xlu0 %1486, %v1417_v31  }
  0x3e   : > { %1159 = vperm.xlu1 %1487, %v1418_v33  }
  0x41   : > { %1379 = vmatmul.mubr.msk.bf16.gmra.mrb[16].mxu0 %vm362_vm1, %v1492_v27  ;;  %1209 = vperm.xlu0 %1486, %v1206_v34  }
  0x42   : > { %470 = vmatprep.mubr.bf16.mxu0 %v1580_v0 }
  0x49   : > { %1380 = vmatmul.mubr.msk.bf16.gmra.mrb[20].mxu0 %vm362_vm1, %v1493_v32 }
  0x4a   : > { %1248 = vmatprep.mubr.bf16.mxu0 %v1580_v0 }
  0x90   : > { %v508_v40 = vpop.permute.xlu0 %507  ;;  %v532_v41 = vpop.permute.xlu1 %531 }
  0x91   : > { %v516_v45 = vrot.slane %v508_v40, %v1792_v42  ;;  %v540_v58 = vrot.slane %v532_v41, %v1792_v42 }
  0x94   : > { %v520_v43 = vpop.permute.xlu0 %519  ;;  %v544_v44 = vpop.permute.xlu1 %543 }
  0x95   : > { %v528_v46 = vrot.slane %v520_v43, %v1792_v42  ;;  %v552_v59 = vrot.slane %v544_v44, %v1792_v42  ;;  %v1495_v44 = vld [vmem:[%s1995_s3 + $0x8] sm:$0xff]  }
  0x97   : > { %v1381_v48 = vcombine.low %v516_v45, %v528_v46  ;;  %v1382_v5 = vcombine.low %v540_v58, %v552_v59 }
  0x98   : > { %v556_v49 = vpop.permute.xlu0 %555  ;;  %v568_v51 = vpop.permute.xlu1 %567 }
  0x99   : > { %v564_v14 = vrot.slane %v556_v49, %v1792_v42  ;;  %v576_v15 = vrot.slane %v568_v51, %v1792_v42 }
  0x9b   : > { %v1383_v22 = vcombine.low %v564_v14, %v576_v15 }
  0x9c   : > { %v1798_v60 = vpop.permute.xlu0 %805 }
  0x9d   : > { %v1800_v62 = vpop.permute.xlu1 %817  ;;  %v814_v14 = vrot.slane %v1798_v60, %v1792_v42 }
  0x9e   : > { %v826_v15 = vrot.slane %v1800_v62, %v1792_v42 }
  0xa0   : > { %v580_v10 = vpop.permute.xlu0 %579 }
  0xa1   : > { %v592_v12 = vpop.permute.xlu1 %591  ;;  %v588_v32 = vrot.slane %v580_v10, %v1792_v42 }
  0xa2   : > { %v600_v33 = vrot.slane %v592_v12, %v1792_v42 }
  0xa4   : > { %v1812_v23 = vpop.permute.xlu0 %829  ;;  %v1384_v39 = vcombine.low %v588_v32, %v600_v33 }
  0xa5   : > { %v1816_v27 = vpop.permute.xlu1 %841  ;;  %v838_v32 = vrot.slane %v1812_v23, %v1792_v42 }
  0xa6   : > { %v850_v60 = vrot.slane %v1816_v27, %v1792_v42 }
  0xa8   : > { %v604_v35 = vpop.permute.xlu0 %603 }
  0xa9   : > { %v616_v37 = vpop.permute.xlu1 %615 }
  0xac   : > { %v1840_v49 = vpop.permute.xlu0 %964 }
  0xb0   : > { %v628_v59 = vpop.permute.xlu0 %627 }
  0xf4   : > { %v422_v47 = vpop.f32.mrb[0].mxu0 }
  0xf5   : > { %v424_v50 = vpop.f32.mrb[1].mxu0 }
  0xf6   : > { %v426_v52 = vpop.f32.mrb[2].mxu0 }
  0xf7   : > { %v481_v53 = vpack.c.bf16 %v426_v52, %v422_v47  ;;  %v428_v54 = vpop.f32.mrb[3].mxu0  ;;  %v612_v47 = vrot.slane %v604_v35, %v1792_v42 }
  0xf8   : > { %v482_v55 = vpack.c.bf16 %v428_v54, %v424_v50  ;;  %v1842_v50 = vpop.permute.xlu1 %976 }
  0xf9   : > { %v685_v56 = vadd.bf16 %v1381_v48, %v481_v53 }
  0xfa   : > { %v686_v57 = vadd.bf16 %v1381_v48, %v482_v55  ;;  %v624_v48 = vrot.slane %v616_v37, %v1792_v42 }
  0xfb   : > { %v697_v61 = vmul.bf16 1045249613, %v685_v56 }
  0xfc   : > { %v432_v63 = vpop.f32.mrb[4].mxu0  ;;  %v698_v1 = vmul.bf16 1045249613, %v686_v57  ;;  %v1385_v54 = vcombine.low %v612_v47, %v624_v48 }
  0xfd   : > { %v434_v2 = vpop.f32.mrb[5].mxu0  ;;  %v1804_v8 = vmax.bf16 %v697_v61, %v685_v56  ;;  %v640_v61 = vpop.permute.xlu1 %639 }
  0xfe   : > { %v436_v3 = vpop.f32.mrb[6].mxu0  ;;  %v1802_v4 = vmax.bf16 %v698_v1, %v686_v57  ;;  %v636_v1 = vrot.slane %v628_v59, %v1792_v42 }
  0xff   : > { %v483_v6 = vpack.c.bf16 %v436_v3, %v432_v63  ;;  %v438_v7 = vpop.f32.mrb[7].mxu0 }
 0x100   : > { %v484_v9 = vpack.c.bf16 %v438_v7, %v434_v2  ;;  %742 = vmatprep.subr.bf16.mxu1 %v1802_v4  ;;  %v648_v2 = vrot.slane %v640_v61, %v1792_v42 }
 0x101   : > { %v687_v11 = vadd.bf16 %v1382_v5, %v483_v6  ;;  %743 = vmatpush1.bf16.msra.mxu1 %v1804_v8 }
 0x102   : > { %v688_v13 = vadd.bf16 %v1382_v5, %v484_v9  ;;  %v1386_v7 = vcombine.low %v636_v1, %v648_v2 }
 0x103   : > { %v699_v16 = vmul.bf16 1045249613, %v687_v11 }
 0x104   : > { %v700_v17 = vmul.bf16 1045249613, %v688_v13  ;;  %v442_v18 = vpop.f32.mrb[8].mxu0 }
 0x105   : > { %v444_v19 = vpop.f32.mrb[9].mxu0  ;;  %v1814_v26 = vmax.bf16 %v699_v16, %v687_v11 }
 0x106   : > { %v446_v20 = vpop.f32.mrb[10].mxu0  ;;  %v1810_v21 = vmax.bf16 %v700_v17, %v688_v13 }
 0x107   : > { %v485_v24 = vpack.c.bf16 %v446_v20, %v442_v18  ;;  %v448_v25 = vpop.f32.mrb[11].mxu0 }
 0x108   : > { %v486_v28 = vpack.c.bf16 %v448_v25, %v444_v19  ;;  %744 = vmatprep.subr.bf16.mxu1 %v1810_v21  ;;  %v1391_v19 = vcombine.low %v814_v14, %v826_v15 }
 0x109   : > { %v1822_v30 = vadd.bf16 %v1383_v22, %v485_v24  ;;  %745 = vmatpush1.bf16.msra.mxu1 %v1814_v26 }
 0x10a   : > { %v1825_v31 = vadd.bf16 %v1383_v22, %v486_v28 }
 0x10b   : > { %v701_v33 = vmul.bf16 1045249613, %v1822_v30 }
 0x10c   : > { %v452_v34 = vpop.f32.mrb[12].mxu0  ;;  %1389 = vmatmul.mubr.msk.bf16.vlgmr.msra.gmra.mrb[0].mxu1 %vm735_vm2, %v1494_v29  ;;  %v702_v28 = vmul.bf16 1045249613, %v1825_v31 }
 0x10d   : > { %v454_v36 = vpop.f32.mrb[13].mxu0  ;;  %784 = vmatprep.mubr.bf16.mxu1 %v1580_v0 }
 0x10e   : > { %v456_v38 = vpop.f32.mrb[14].mxu0 }
 0x10f   : > { %v487_v40 = vpack.c.bf16 %v456_v38, %v452_v34  ;;  %v458_v41 = vpop.f32.mrb[15].mxu0  ;;  %v1867_v38 = vmax.bf16 %v702_v28, %v1825_v31 }
 0x110   : > { %v488_v43 = vpack.c.bf16 %v458_v41, %v454_v36  ;;  %v1392_v41 = vcombine.low %v838_v32, %v850_v60 }
 0x111   : > { %v1834_v45 = vadd.bf16 %v1384_v39, %v487_v40 }
 0x112   : > { %v1836_v46 = vadd.bf16 %v1384_v39, %v488_v43  ;;  %v1870_v43 = vmax.bf16 %v701_v33, %v1822_v30 }
 0x113   : > { %v703_v30 = vmul.bf16 1045249613, %v1834_v45 }
 0x114   : > { %v462_v51 = vpop.f32.mrb[16].mxu0  ;;  %1390 = vmatmul.mubr.msk.bf16.gmra.mrb[4].mxu1 %vm735_vm2, %v1495_v44  ;;  %v704_v31 = vmul.bf16 1045249613, %v1836_v46 }
 0x115   : > { %v464_v52 = vpop.f32.mrb[17].mxu0  ;;  %932 = vmatprep.mubr.bf16.mxu1 %v1580_v0  ;;  %v1882_v61 = vmax.bf16 %v703_v30, %v1834_v45  ;;  %v985_v45 = vrot.slane %v1842_v50, %v1792_v42 }
 0x116   : > { %v466_v53 = vpop.f32.mrb[18].mxu0  ;;  %v1879_v59 = vmax.bf16 %v704_v31, %v1836_v46 }
 0x117   : > { %v489_v55 = vpack.c.bf16 %v466_v53, %v462_v51  ;;  %v468_v56 = vpop.f32.mrb[19].mxu0 }
 0x118   : > { %v490_v57 = vpack.c.bf16 %v468_v56, %v464_v52 }
 0x119   : > { %v1846_v58 = vadd.bf16 %v1385_v54, %v489_v55 }
 0x11a   : > { %v1848_v63 = vadd.bf16 %v1385_v54, %v490_v57 }
 0x11c   : > { %v472_v3 = vpop.f32.mrb[20].mxu0 }
 0x11d   : > { %v474_v5 = vpop.f32.mrb[21].mxu0 }
 0x11e   : > { %v476_v6 = vpop.f32.mrb[22].mxu0 }
 0x11f   : > { %v491_v9 = vpack.c.bf16 %v476_v6, %v472_v3  ;;  %v478_v10 = vpop.f32.mrb[23].mxu0 }
 0x120   : > { %v492_v11 = vpack.c.bf16 %v478_v10, %v474_v5  ;;  %v1496_v5 = vld [vmem:[%s1995_s3 + $0x10] sm:$0xff]  }
 0x121   : > { %v1852_v12 = vadd.bf16 %v1386_v7, %v491_v9 }
 0x122   : > { %v1854_v13 = vadd.bf16 %v1386_v7, %v492_v11 }
 0x1df   : > { %v776_v16 = vpop.f32.mrb[0].mxu1 }
 0x1e0   : > { %v778_v17 = vpop.f32.mrb[1].mxu1 }
 0x1e1   : > { %v780_v18 = vpop.f32.mrb[2].mxu1 }
 0x1e2   : > { %v795_v20 = vpack.c.bf16 %v780_v18, %v776_v16  ;;  %v782_v22 = vpop.f32.mrb[3].mxu1  ;;  %v989_v16 = vpop.permute.xlu0 %988  ;;  %v706_v18 = vmul.bf16 1045249613, %v1848_v63 }
 0x1e3   : > { %v796_v24 = vpack.c.bf16 %v782_v22, %v778_v17  ;;  %v1001_v17 = vpop.permute.xlu1 %1000  ;;  %v705_v22 = vmul.bf16 1045249613, %v1846_v58 }
 0x1e4   : > { %v863_v25 = vadd.bf16 %v1391_v19, %v795_v20  ;;  %v997_v20 = vrot.slane %v989_v16, %v1792_v42  ;;  %v1907_v32 = vmax.bf16 %v706_v18, %v1848_v63  ;;  %v708_v63 = vmul.bf16 1045249613, %v1854_v13 }
 0x1e5   : > { %v864_v29 = vadd.bf16 %v1391_v19, %v796_v24 }
 0x1e6   : > { %v867_v62 = vmul.bf16 1045249613, %v863_v25 }
 0x1e7   : > { %v868_v34 = vmul.bf16 1045249613, %v864_v29  ;;  %v786_v35 = vpop.f32.mrb[4].mxu1 }
 0x1e8   : > { %v871_v36 = vmax.bf16 %v867_v62, %v863_v25  ;;  %v788_v37 = vpop.f32.mrb[5].mxu1 }
 0x1e9   : > { %v872_v39 = vmax.bf16 %v868_v34, %v864_v29  ;;  %v790_v40 = vpop.f32.mrb[6].mxu1  ;;  %v1910_v34 = vmax.bf16 %v705_v22, %v1846_v58  ;;  %v707_v58 = vmul.bf16 1045249613, %v1852_v12 }
 0x1ea   : > { %v797_v23 = vpack.c.bf16 %v790_v40, %v786_v35  ;;  %v792_v44 = vpop.f32.mrb[7].mxu1  ;;  %v880_v51 = vadd.bf16 %v871_v36, %v1870_v43  ;;  %v1193_v52 = vadd.bf16 %v871_v36, %v1804_v8 }
 0x1eb   : > { %v798_v47 = vpack.c.bf16 %v792_v44, %v788_v37  ;;  %v881_v27 = vadd.bf16 %v872_v39, %v1867_v38  ;;  %v1194_v48 = vadd.bf16 %v872_v39, %v1802_v4 }
 0x1ec   : > { %v865_v53 = vadd.bf16 %v1392_v41, %v797_v23 }
 0x1ed   : > { %v866_v54 = vadd.bf16 %v1392_v41, %v798_v47  ;;  %900 = vmatprep.subr.bf16.mxu1 %v881_v27  ;;  %1216 = vmatprep.subr.bf16.mxu0 %v1194_v48 }
 0x1ee   : > { %v869_v55 = vmul.bf16 1045249613, %v865_v53  ;;  %901 = vmatpush1.bf16.msra.mxu1 %v880_v51  ;;  %1217 = vmatpush1.bf16.msra.mxu0 %v1193_v52  ;;  %v720_v52 = vmax.bf16 %v708_v63, %v1854_v13  ;;  %v1124_v13 = vpop.permute.xlu0 %1123 }
 0x1ef   : > { %v870_v56 = vmul.bf16 1045249613, %v866_v54 }
 0x1f0   : > { %v873_v57 = vmax.bf16 %v869_v55, %v865_v53  ;;  %v719_v53 = vmax.bf16 %v707_v58, %v1852_v12  ;;  %v1498_v55 = vld [vmem:[%s1995_s3 + $0x20] sm:$0xff]   ;;  %v1499_v12 = vld [vmem:[%s1995_s3 + $0x28] sm:$0xff]  }
 0x1f1   : > { %v874_v4 = vmax.bf16 %v870_v56, %v866_v54  ;;  %v1136_v56 = vpop.permute.xlu1 %1135 }
 0x1f2   : > { %v882_v2 = vadd.bf16 %v873_v57, %v1882_v61  ;;  %v1195_v3 = vadd.bf16 %v873_v57, %v1814_v26  ;;  %v973_v26 = vrot.slane %v1840_v49, %v1792_v42  ;;  %v1009_v49 = vrot.slane %v1001_v17, %v1792_v42 }
 0x1f3   : > { %v883_v8 = vadd.bf16 %v874_v4, %v1879_v59  ;;  %v1196_v1 = vadd.bf16 %v874_v4, %v1810_v21  ;;  %v1497_v21 = vld [vmem:[%s1995_s3 + $0x18] sm:$0xff]   ;;  %v1132_v57 = vrot.slane %v1124_v13, %v1792_v42 }
 0x1f4   : > { %v1405_v9 = vcombine.low %v973_v26, %v985_v45  ;;  %v1406_v62 = vcombine.low %v997_v20, %v1009_v49  ;;  %v1148_v26 = vpop.permute.xlu0 %1147 }
 0x1f5   : > { %902 = vmatprep.subr.bf16.mxu1 %v883_v8  ;;  %1218 = vmatprep.subr.bf16.mxu0 %v1196_v1 }
 0x1f6   : > { %903 = vmatpush1.bf16.msra.mxu1 %v882_v2  ;;  %1219 = vmatpush1.bf16.msra.mxu0 %v1195_v3 }
 0x1f9   : > { %1399 = vmatmul.mubr.msk.bf16.vlgmr.msra.gmra.mrb[8].mxu1 %vm735_vm2, %v1496_v5  ;;  %v1160_v5 = vpop.permute.xlu1 %1159 }
 0x1fa   : > { %942 = vmatprep.mubr.bf16.mxu1 %v1580_v0 }
 0x201   : > { %1400 = vmatmul.mubr.msk.bf16.gmra.mrb[12].mxu1 %vm735_vm2, %v1497_v21 }
 0x202   : > { %1091 = vmatprep.mubr.bf16.mxu1 %v1580_v0 }
 0x2cc   : > { %v934_v46 = vpop.f32.mrb[8].mxu1 }
 0x2cd   : > { %v936_v6 = vpop.f32.mrb[9].mxu1 }
 0x2ce   : > { %v938_v7 = vpop.f32.mrb[10].mxu1 }
 0x2cf   : > { %v953_v10 = vpack.c.bf16 %v938_v7, %v934_v46  ;;  %v940_v11 = vpop.f32.mrb[11].mxu1  ;;  %v1156_v46 = vrot.slane %v1148_v26, %v1792_v42 }
 0x2d0   : > { %v954_v14 = vpack.c.bf16 %v940_v11, %v936_v6  ;;  %v1168_v6 = vrot.slane %v1160_v5, %v1792_v42 }
 0x2d1   : > { %v1022_v15 = vadd.bf16 %v1405_v9, %v953_v10 }
 0x2d2   : > { %v1023_v19 = vadd.bf16 %v1405_v9, %v954_v14  ;;  %v1420_v17 = vcombine.low %v1156_v46, %v1168_v6 }
 0x2d3   : > { %v1026_v50 = vmul.bf16 1045249613, %v1022_v15 }
 0x2d4   : > { %v1027_v24 = vmul.bf16 1045249613, %v1023_v19  ;;  %v944_v25 = vpop.f32.mrb[12].mxu1 }
 0x2d5   : > { %v1030_v28 = vmax.bf16 %v1026_v50, %v1022_v15  ;;  %v946_v29 = vpop.f32.mrb[13].mxu1 }
 0x2d6   : > { %v1031_v60 = vmax.bf16 %v1027_v24, %v1023_v19  ;;  %v948_v33 = vpop.f32.mrb[14].mxu1 }
 0x2d7   : > { %v955_v35 = vpack.c.bf16 %v948_v33, %v944_v25  ;;  %v950_v36 = vpop.f32.mrb[15].mxu1  ;;  %v1039_v41 = vadd.bf16 %v1030_v28, %v1910_v34  ;;  %v1197_v23 = vadd.bf16 %v1030_v28, %v1870_v43 }
 0x2d8   : > { %v956_v37 = vpack.c.bf16 %v950_v36, %v946_v29  ;;  %v1040_v39 = vadd.bf16 %v1031_v60, %v1907_v32  ;;  %v1198_v40 = vadd.bf16 %v1031_v60, %v1867_v38 }
 0x2d9   : > { %v1024_v44 = vadd.bf16 %v1406_v62, %v955_v35 }
 0x2da   : > { %v1025_v47 = vadd.bf16 %v1406_v62, %v956_v37  ;;  %1059 = vmatprep.subr.bf16.mxu1 %v1040_v39  ;;  %1220 = vmatprep.subr.bf16.mxu0 %v1198_v40  ;;  %v1210_v62 = vpop.permute.xlu0 %1209 }
 0x2db   : > { %v1028_v27 = vmul.bf16 1045249613, %v1024_v44  ;;  %1060 = vmatpush1.bf16.msra.mxu1 %v1039_v41  ;;  %1221 = vmatpush1.bf16.msra.mxu0 %v1197_v23 }
 0x2dc   : > { %v1029_v48 = vmul.bf16 1045249613, %v1025_v47 }
 0x2dd   : > { %v1032_v51 = vmax.bf16 %v1028_v27, %v1024_v44 }
 0x2de   : > { %v1033_v38 = vmax.bf16 %v1029_v48, %v1025_v47 }
 0x2df   : > { %v1041_v54 = vadd.bf16 %v1032_v51, %v719_v53  ;;  %v1199_v30 = vadd.bf16 %v1032_v51, %v1882_v61 }
 0x2e0   : > { %v1042_v31 = vadd.bf16 %v1033_v38, %v720_v52  ;;  %v1200_v43 = vadd.bf16 %v1033_v38, %v1879_v59  ;;  %v1144_v59 = vrot.slane %v1136_v56, %v1792_v42 }
 0x2e2   : > { %1061 = vmatprep.subr.bf16.mxu1 %v1042_v31  ;;  %1222 = vmatprep.subr.bf16.mxu0 %v1200_v43  ;;  %v1419_v1 = vcombine.low %v1132_v57, %v1144_v59 }
 0x2e3   : > { %1062 = vmatpush1.bf16.msra.mxu1 %v1041_v54  ;;  %1223 = vmatpush1.bf16.msra.mxu0 %v1199_v30 }
 0x2e6   : > { %1413 = vmatmul.mubr.msk.bf16.vlgmr.msra.gmra.mrb[16].mxu1 %vm735_vm2, %v1498_v55 }
 0x2e7   : > { %1101 = vmatprep.mubr.bf16.mxu1 %v1580_v0 }
 0x2ee   : > { %1414 = vmatmul.mubr.msk.bf16.gmra.mrb[20].mxu1 %vm735_vm2, %v1499_v12 }
 0x3b9   : > { %v1093_v4 = vpop.f32.mrb[16].mxu1 }
 0x3ba   : > { %v1095_v61 = vpop.f32.mrb[17].mxu1 }
 0x3bb   : > { %v1097_v8 = vpop.f32.mrb[18].mxu1 }
 0x3bc   : > { %v1112_v2 = vpack.c.bf16 %v1097_v8, %v1093_v4  ;;  %v1099_v3 = vpop.f32.mrb[19].mxu1 }
 0x3bd   : > { %v1113_v0 = vpack.c.bf16 %v1099_v3, %v1095_v61 }
 0x3be   : > { %v1181_v21 = vadd.bf16 %v1419_v1, %v1112_v2 }
 0x3bf   : > { %v1182_v45 = vadd.bf16 %v1419_v1, %v1113_v0 }
 0x3c0   : > { %v1185_v7 = vmul.bf16 1045249613, %v1181_v21 }
 0x3c1   : > { %v1186_v9 = vmul.bf16 1045249613, %v1182_v45  ;;  %v1103_v10 = vpop.f32.mrb[20].mxu1 }
 0x3c2   : > { %v1189_v11 = vmax.bf16 %v1185_v7, %v1181_v21  ;;  %v1105_v14 = vpop.f32.mrb[21].mxu1 }
 0x3c3   : > { %v1190_v15 = vmax.bf16 %v1186_v9, %v1182_v45  ;;  %v1107_v16 = vpop.f32.mrb[22].mxu1 }
 0x3c4   : > { %v1114_v18 = vpack.c.bf16 %v1107_v16, %v1103_v10  ;;  %v1109_v19 = vpop.f32.mrb[23].mxu1  ;;  %v1201_v22 = vadd.bf16 %v1189_v11, %v1910_v34 }
 0x3c5   : > { %v1115_v20 = vpack.c.bf16 %v1109_v19, %v1105_v14  ;;  %v1202_v49 = vadd.bf16 %v1190_v15, %v1907_v32  ;;  %v1205_v32 = vld [vmem:[%s1997_s5] sm:$0x3] }
 0x3c6   : > { %v1183_v50 = vadd.bf16 %v1420_v17, %v1114_v18 }
 0x3c7   : > { %v1184_v24 = vadd.bf16 %v1420_v17, %v1115_v20  ;;  %1224 = vmatprep.subr.bf16.mxu0 %v1202_v49 }
 0x3c8   : > { %v1187_v42 = vmul.bf16 1045249613, %v1183_v50  ;;  %1225 = vmatpush1.bf16.msra.mxu0 %v1201_v22 }
 0x3c9   : > { %v1188_v25 = vmul.bf16 1045249613, %v1184_v24 }
 0x3ca   : > { %v1191_v28 = vmax.bf16 %v1187_v42, %v1183_v50 }
 0x3cb   : > { %v1192_v29 = vmax.bf16 %v1188_v25, %v1184_v24 }
 0x3cc   : > { %v1203_v33 = vadd.bf16 %v1191_v28, %v719_v53 }
 0x3cd   : > { %v1204_v60 = vadd.bf16 %v1192_v29, %v720_v52 }
 0x3cf   : > { %1226 = vmatprep.subr.bf16.mxu0 %v1204_v60 }
 0x3d0   : > { %1227 = vmatpush1.bf16.msra.mxu0 %v1203_v33 }
 0x3d3   : > { %1421 = vmatmul.mubr.msk.bf16.vlgmr.msra.gmra.mrb[24].mxu0 %vm1212_vm3, %v1205_v32 }
 0x4a6   : > { %v1250_v34 = vpop.f32.mrb[24].mxu0 }
 0x4a7   : > { %v1251_v35 = vadd.f32 %v1250_v34, %v1210_v62  ;;  %v1252_v36 = vpop.f32.mrb[25].mxu0 }
 0x4a8   : > { %v1253_v37 = vadd.f32 %v1252_v36, %v1210_v62  ;;  %v1254_v39 = vpop.f32.mrb[26].mxu0 }
 0x4a9   : > { %v1257_v40 = vmul.f32 0.2, %v1251_v35  ;;  %v1255_v41 = vpop.f32.mrb[27].mxu0 }
 0x4aa   : > { %v1258_v23 = vmul.f32 0.2, %v1253_v37 }
 0x4ab   : > { %v1259_v44 = vmax.f32 %v1251_v35, %v1257_v40 }
 0x4ac   : > { %v1260_v63 = vmax.f32 %v1253_v37, %v1258_v23 }
 0x4ae   : > { %v1263_v47 = vcombine.low %v1259_v44, %v1260_v63 }
 0x4b0   : > { %1265 = vst [vmem:[%s296_s21] sm:$0xff] %v1263_v47 }
 0x4b1   : > { %1513 = shalt.err (!%p1510_p5)
}
 0x4b2   : > { %s1514_s17 = scalar_lea.hbm %s1945_s8, 128  ;;  %s1518_s20 = scalar_lea.hbm %s1999_s7, 256 }
 0x4b3   : > { %p1515_p6 = scmp.ne.s32.totalorder %s1945_s8, %s1514_s17  ;;  %p1519_p10 = scmp.lt.u32.totalorder %s1945_s8, %s1999_s7 }
 0x4b4   : > { %p1520_p11 = scmp.lt.u32.totalorder %s1518_s20, %s1514_s17  ;;  %p1522_p13 = scmp.lt.u32.totalorder %s1514_s17, %s1945_s8 }
 0x4b5   : > { %p1516_p7 = pnand %p1515_p6, %p1663_p4 }
 0x4b6   : > { %p1521_p12 = por %p1520_p11, %p1519_p10 }
 0x4b7   : > { %p1517_p9 = pneg %p1516_p7 }
 0x4b8   : > { %p1523_p0 = por %p1522_p13, %p1521_p12 }
 0x4ba   : > { %p1524_p1 = pnand %p1523_p0, %p1517_p9 }
 0x4bc   : > { %1527 = shalt.err (!%p1524_p1)
}
 0x4bd   : > { %1429 = dma.vmem_to_hbm [thread:$0]  (%p1663_p4), %s1947_s22, 128, %s1945_s8, %s1267_s10  }
 0x4be PF: > { %p1435_p2 = scmp.ge.s32.totalorder %s1578_s29, 2  ;;  %s1295_s30 = sand.u32 1, %s1558_s24  }
 0x4bf   : > { %s1296_s12 = scalar_lea.sflag [#allocation3], %s1295_s30 }
 0x4c0   : > { %p1432_p3 = pnand %p1435_p2, %p1670_p8 }
 0x4c2   : > { %1553 = dma.done.wait (!%p1432_p3), %s1296_s12, 128  }
 0x4c3   : > { %1555 = vsyncadd (!%p1432_p3), %s1296_s12, 4294967168  ;;  %s20_s29 = sadd.s32 1, %s1578_s29   ;;  %s2002_s24 = smov %s1562_s25 }
 0x4c4   : > { %p17_p5 = scmp.ge.s32.totalorder %s20_s29, 4   ;;  %s2003_s25 = smov %s1566_s26 }
 0x4c5   : > { %s2004_s26 = smov %s1676_s14  ;;  %s2005_s27 = smov %s1574_s28 }
 0x4c6   : > { %s2006_s28 = smov %s2008_s9  ;;  %19 = sbr.rel (!%p17_p5) target bundleno = 4 (0x4), region = 87 }
 0x4cd   :  { %1301 = vsyncpa [#allocation3], 1 }
 0x4ce   :  { %1303 = vsyncpa [#allocation3 + $0x1], 1 }

</bundles_post_ra>
